<compile_context>
chip_gen: v7x
topology: tpu7x:2x2x1
jax: 0.10.0
libtpu: 0.0.40
codegen_flags: <defaults>
</compile_context>

<pallas_src>
import functools

import jax
import jax.numpy as jnp
from jax.experimental import pallas as pl
from jax.experimental.pallas import tpu as pltpu


def _round_up(x, m):
    return ((x + m - 1) // m) * m


def _bert_outer_kernel(x_ref, w_ref, b_ref, g_ref, bt_ref, o_ref, acc_ref):
    """One (row-tile i, K-tile k) grid step of dense + bias + LayerNorm.

    x_ref  : (tm, tk)  activation rows (slice of intermediate dim)
    w_ref  : (tk, H)   weight slab
    b_ref  : (1, H)    dense bias
    g_ref  : (1, H)    layernorm gamma
    bt_ref : (1, H)    layernorm beta
    o_ref  : (tm, H)   output rows
    acc_ref: (tm, H)   f32 matmul accumulator (VMEM scratch, lives across k)
    """
    k = pl.program_id(1)

    @pl.when(k == 0)
    def _():
        acc_ref[...] = jnp.zeros_like(acc_ref)

    # Native-dtype operands straight to the MXU; f32 accumulation.
    acc_ref[...] += jnp.dot(x_ref[...], w_ref[...],
                            preferred_element_type=jnp.float32)

    @pl.when(k == pl.num_programs(1) - 1)
    def _():
        y = acc_ref[...] + b_ref[...].astype(jnp.float32)
        # TODO(synk): dropout is identity here (inference mode); for training,
        # draw a keep-mask with pltpu.prng_random_bits and scale by 1/(1-p).
        mean = jnp.mean(y, axis=-1, keepdims=True)
        c = y - mean
        var = jnp.mean(c * c, axis=-1, keepdims=True)
        inv = jax.lax.rsqrt(var + jnp.float32(1e-12))
        out = c * inv * g_ref[...].astype(jnp.float32) \
            + bt_ref[...].astype(jnp.float32)
        o_ref[...] = out.astype(o_ref.dtype)


@functools.partial(jax.jit, static_argnames=("tm", "tk"))
def bert_outer(x, w, b, gamma, beta, *, tm=256, tk=512):
    """x: [B, S, I], w: [I, H], b/gamma/beta: [H]  ->  [B, S, H]"""
    B, S, I = x.shape
    H = w.shape[1]
    M = B * S

    # Clamp tiles to the (padded) problem and keep (8, 128) alignment.
    tm = min(tm, _round_up(M, 8))
    tk = min(tk, _round_up(I, 128))

    M_pad = _round_up(M, tm)
    K_pad = _round_up(I, tk)

    x2 = x.reshape(M, I)
    if (M_pad != M) or (K_pad != I):
        x2 = jnp.pad(x2, ((0, M_pad - M), (0, K_pad - I)))
    w2 = jnp.pad(w, ((0, K_pad - I), (0, 0))) if K_pad != I else w

    b2 = b.reshape(1, H)
    g2 = gamma.reshape(1, H)
    bt2 = beta.reshape(1, H)

    out = pl.pallas_call(
        _bert_outer_kernel,
        out_shape=jax.ShapeDtypeStruct((M_pad, H), x.dtype),
        grid_spec=pltpu.PrefetchScalarGridSpec(
            num_scalar_prefetch=0,
            grid=(M_pad // tm, K_pad // tk),
            in_specs=[
                pl.BlockSpec((tm, tk), lambda i, k: (i, k)),   # activation tile
                pl.BlockSpec((tk, H), lambda i, k: (k, 0)),    # weight slab
                pl.BlockSpec((1, H), lambda i, k: (0, 0)),     # dense bias
                pl.BlockSpec((1, H), lambda i, k: (0, 0)),     # ln gamma
                pl.BlockSpec((1, H), lambda i, k: (0, 0)),     # ln beta
            ],
            out_specs=pl.BlockSpec((tm, H), lambda i, k: (i, 0)),
            scratch_shapes=[pltpu.VMEM((tm, H), jnp.float32)],
        ),
        compiler_params=pltpu.CompilerParams(
            dimension_semantics=("parallel", "arbitrary"),
            vmem_limit_bytes=64 * 1024 * 1024,
        ),
    )(x2, w2, b2, g2, bt2)

    return out[:M].reshape(B, S, H)


def _reference(x, w, b, gamma, beta, eps=1e-12):
    y = x @ w + b                                   # dense (dropout = identity)
    mean = jnp.mean(y, axis=-1, keepdims=True)
    var = jnp.mean((y - mean) ** 2, axis=-1, keepdims=True)
    return (y - mean) / jnp.sqrt(var + eps) * gamma + beta


if __name__ == "__main__":
    # Small config consistent with the module: intermediate_size=128,
    # hidden_size=32.  Input x: [batch=2, seq=8, intermediate=128].
    key = jax.random.PRNGKey(0)
    kx, kw, kb, kg, kbt = jax.random.split(key, 5)

    B, S, I, H = 2, 8, 128, 32
    x = jax.random.normal(kx, (B, S, I), dtype=jnp.float32)
    # Deterministic synthetic "Linear" / LayerNorm parameters.
    w = jax.random.normal(kw, (I, H), dtype=jnp.float32) * 0.02   # [I, H]
    b = jax.random.normal(kb, (H,), dtype=jnp.float32) * 0.02
    gamma = 1.0 + jax.random.normal(kg, (H,), dtype=jnp.float32) * 0.02
    beta = jax.random.normal(kbt, (H,), dtype=jnp.float32) * 0.02

    out = bert_outer(x, w, b, gamma, beta)
    jax.block_until_ready(out)

    ref = _reference(x, w, b, gamma, beta)
    assert out.shape == (B, S, H)
    assert jnp.allclose(out, ref, atol=1e-4, rtol=1e-4), "mismatch vs reference"

    print("KERNEL_OK")
</pallas_src>

<mosaic_0001>
module attributes {stable_mosaic.version = 11 : i64} {
  func.func @_bert_outer_kernel(%arg0: i32, %arg1: i32, %arg2: memref<16x128xf32, #tpu.memory_space<vmem>>, %arg3: memref<128x32xf32, #tpu.memory_space<vmem>>, %arg4: memref<1x32xf32, #tpu.memory_space<vmem>>, %arg5: memref<1x32xf32, #tpu.memory_space<vmem>>, %arg6: memref<1x32xf32, #tpu.memory_space<vmem>>, %arg7: memref<16x32xf32, #tpu.memory_space<vmem>>, %arg8: memref<16x32xf32, #tpu.memory_space<vmem>>) attributes {dimension_semantics = [#tpu.dimension_semantics<parallel>, #tpu.dimension_semantics<arbitrary>], iteration_bounds = array<i64: 1, 1>, scalar_prefetch = 0 : i64, scratch_operands = 1 : i64, tpu.core_type = #tpu.core_type<tc>, window_params = [{transform_indices = @transform_0, window_bounds = array<i64: 16, 128>}, {transform_indices = @transform_1, window_bounds = array<i64: 128, 32>}, {pipeline_mode = #tpu.pipeline_mode<synchronous>, transform_indices = @transform_2, window_bounds = array<i64: 1, 32>}, {pipeline_mode = #tpu.pipeline_mode<synchronous>, transform_indices = @transform_3, window_bounds = array<i64: 1, 32>}, {pipeline_mode = #tpu.pipeline_mode<synchronous>, transform_indices = @transform_4, window_bounds = array<i64: 1, 32>}, {transform_indices = @transform_5, window_bounds = array<i64: 16, 32>}]} {
    %c0_i32 = arith.constant 0 : i32
    %0 = arith.cmpi eq, %arg1, %c0_i32 : i32
    %1 = arith.extui %0 : i1 to i32
    %c0_i32_0 = arith.constant 0 : i32
    %2 = arith.cmpi ne, %1, %c0_i32_0 : i32
    scf.if %2 {
      %cst_10 = arith.constant 0.000000e+00 : f32
      %12 = vector.broadcast %cst_10 : f32 to vector<16x32xf32>
      %c0_11 = arith.constant 0 : index
      %c0_12 = arith.constant 0 : index
      %13 = vector.load %arg8[%c0_11, %c0_12] : memref<16x32xf32, #tpu.memory_space<vmem>>, vector<16x32xf32>
      tpu.vector_store %arg8[%c0_11, %c0_12], %12 {strides = array<i32>} : memref<16x32xf32, #tpu.memory_space<vmem>>, vector<16x32xf32>,
    } else {
    }
    %c0 = arith.constant 0 : index
    %c0_1 = arith.constant 0 : index
    %3 = vector.load %arg8[%c0, %c0_1] : memref<16x32xf32, #tpu.memory_space<vmem>>, vector<16x32xf32>
    %c0_2 = arith.constant 0 : index
    %c0_3 = arith.constant 0 : index
    %4 = vector.load %arg2[%c0_2, %c0_3] : memref<16x128xf32, #tpu.memory_space<vmem>>, vector<16x128xf32>
    %c0_4 = arith.constant 0 : index
    %c0_5 = arith.constant 0 : index
    %5 = vector.load %arg3[%c0_4, %c0_5] : memref<128x32xf32, #tpu.memory_space<vmem>>, vector<128x32xf32>
    %cst = arith.constant dense<0.000000e+00> : vector<16x32xf32>
    %6 = tpu.matmul %4, %5, %cst {dimension_numbers = #tpu.dot_dimension_numbers<[1], [0], [0], [1], [0, 0, 1, 1], [], []>} : vector<16x128xf32>, vector<128x32xf32>, vector<16x32xf32> -> vector<16x32xf32>
    %7 = arith.addf %3, %6 : vector<16x32xf32>
    %c0_6 = arith.constant 0 : index
    %c0_7 = arith.constant 0 : index
    %8 = vector.load %arg8[%c0_6, %c0_7] : memref<16x32xf32, #tpu.memory_space<vmem>>, vector<16x32xf32>
    tpu.vector_store %arg8[%c0_6, %c0_7], %7 {strides = array<i32>} : memref<16x32xf32, #tpu.memory_space<vmem>>, vector<16x32xf32>,
    %c0_i32_8 = arith.constant 0 : i32
    %9 = arith.cmpi eq, %arg1, %c0_i32_8 : i32
    %10 = arith.extui %9 : i1 to i32
    %c0_i32_9 = arith.constant 0 : i32
    %11 = arith.cmpi ne, %10, %c0_i32_9 : i32
    scf.if %11 {
      %c0_10 = arith.constant 0 : index
      %c0_11 = arith.constant 0 : index
      %12 = vector.load %arg8[%c0_10, %c0_11] : memref<16x32xf32, #tpu.memory_space<vmem>>, vector<16x32xf32>
      %c0_12 = arith.constant 0 : index
      %c0_13 = arith.constant 0 : index
      %13 = vector.load %arg4[%c0_12, %c0_13] : memref<1x32xf32, #tpu.memory_space<vmem>>, vector<1x32xf32>
      %14 = vector.broadcast %13 : vector<1x32xf32> to vector<16x32xf32>
      %15 = arith.addf %12, %14 : vector<16x32xf32>
      %cst_14 = arith.constant dense<0.000000e+00> : vector<16xf32>
      %16 = vector.multi_reduction <add>, %15, %cst_14 [1] : vector<16x32xf32> to vector<16xf32>
      %17 = vector.shape_cast %16 : vector<16xf32> to vector<16x1xf32>
      %cst_15 = arith.constant 3.200000e+01 : f32
      %18 = vector.broadcast %cst_15 : f32 to vector<16x1xf32>
      %19 = arith.divf %17, %18 : vector<16x1xf32>
      %20 = vector.broadcast %19 : vector<16x1xf32> to vector<16x32xf32>
      %21 = arith.subf %15, %20 : vector<16x32xf32>
      %22 = arith.mulf %21, %21 : vector<16x32xf32>
      %cst_16 = arith.constant dense<0.000000e+00> : vector<16xf32>
      %23 = vector.multi_reduction <add>, %22, %cst_16 [1] : vector<16x32xf32> to vector<16xf32>
      %24 = vector.shape_cast %23 : vector<16xf32> to vector<16x1xf32>
      %cst_17 = arith.constant 3.200000e+01 : f32
      %25 = vector.broadcast %cst_17 : f32 to vector<16x1xf32>
      %26 = arith.divf %24, %25 : vector<16x1xf32>
      %cst_18 = arith.constant 9.99999996E-13 : f32
      %27 = vector.broadcast %cst_18 : f32 to vector<16x1xf32>
      %28 = arith.addf %26, %27 : vector<16x1xf32>
      %29 = math.rsqrt %28 : vector<16x1xf32>
      %30 = vector.broadcast %29 : vector<16x1xf32> to vector<16x32xf32>
      %31 = arith.mulf %21, %30 : vector<16x32xf32>
      %c0_19 = arith.constant 0 : index
      %c0_20 = arith.constant 0 : index
      %32 = vector.load %arg5[%c0_19, %c0_20] : memref<1x32xf32, #tpu.memory_space<vmem>>, vector<1x32xf32>
      %33 = vector.broadcast %32 : vector<1x32xf32> to vector<16x32xf32>
      %34 = arith.mulf %31, %33 : vector<16x32xf32>
      %c0_21 = arith.constant 0 : index
      %c0_22 = arith.constant 0 : index
      %35 = vector.load %arg6[%c0_21, %c0_22] : memref<1x32xf32, #tpu.memory_space<vmem>>, vector<1x32xf32>
      %36 = vector.broadcast %35 : vector<1x32xf32> to vector<16x32xf32>
      %37 = arith.addf %34, %36 : vector<16x32xf32>
      %c0_23 = arith.constant 0 : index
      %c0_24 = arith.constant 0 : index
      %38 = vector.load %arg7[%c0_23, %c0_24] : memref<16x32xf32, #tpu.memory_space<vmem>>, vector<16x32xf32>
      tpu.vector_store %arg7[%c0_23, %c0_24], %37 {strides = array<i32>} : memref<16x32xf32, #tpu.memory_space<vmem>>, vector<16x32xf32>,
    } else {
    }
    return
  }
  func.func @transform_0(%arg0: i32, %arg1: i32) -> (i32, i32) {
    %c0_i32 = arith.constant 0 : i32
    return %arg0, %arg1 : i32, i32
  }
  func.func @transform_1(%arg0: i32, %arg1: i32) -> (i32, i32) {
    %c0_i32 = arith.constant 0 : i32
    %c0_i32_0 = arith.constant 0 : i32
    return %arg1, %c0_i32 : i32, i32
  }
  func.func @transform_2(%arg0: i32, %arg1: i32) -> (i32, i32) {
    %c0_i32 = arith.constant 0 : i32
    %c0_i32_0 = arith.constant 0 : i32
    %c0_i32_1 = arith.constant 0 : i32
    return %c0_i32, %c0_i32_0 : i32, i32
  }
  func.func @transform_3(%arg0: i32, %arg1: i32) -> (i32, i32) {
    %c0_i32 = arith.constant 0 : i32
    %c0_i32_0 = arith.constant 0 : i32
    %c0_i32_1 = arith.constant 0 : i32
    return %c0_i32, %c0_i32_0 : i32, i32
  }
  func.func @transform_4(%arg0: i32, %arg1: i32) -> (i32, i32) {
    %c0_i32 = arith.constant 0 : i32
    %c0_i32_0 = arith.constant 0 : i32
    %c0_i32_1 = arith.constant 0 : i32
    return %c0_i32, %c0_i32_0 : i32, i32
  }
  func.func @transform_5(%arg0: i32, %arg1: i32) -> (i32, i32) {
    %c0_i32 = arith.constant 0 : i32
    %c0_i32_0 = arith.constant 0 : i32
    return %arg0, %c0_i32 : i32, i32
  }
}

</mosaic_0001>

<bundles_post_ra>
// kernel: bert_outer.1
= control target key start
LH: loop header
LB: loop body
LE: loop exit
PB: predicated region body
PF: predicated region fallthrough
CT: control target
= control target key end

     0   :  { %10 = vsyncpa [#allocation4], 0  ;;  %s649_s0 = inlined_call_operand.hbm [shape: f32[16,128], index: 0, kind: input, shape index: {}]   ;;  %s650_s1 = inlined_call_operand.hbm [shape: f32[128,32], index: 1, kind: input, shape index: {}]   ;;  %s651_s2 = inlined_call_operand.hbm [shape: f32[1,32], index: 2, kind: input, shape index: {}]   ;;  %s652_s3 = inlined_call_operand.hbm [shape: f32[1,32], index: 3, kind: input, shape index: {}]   ;;  %s653_s4 = inlined_call_operand.hbm [shape: f32[1,32], index: 4, kind: input, shape index: {}]   ;;  %s654_s5 = inlined_call_operand.hbm [shape: f32[16,32], index: 5, kind: output, shape index: {}]  }
   0x1   :  { %11 = vsyncpa [#allocation7], 0 }
   0x2   :  { %12 = vsyncpa [#allocation10], 0 }
   0x3   :  { %13 = vsyncpa [#allocation5], 0  ;;  %s511_s18 = smov [#allocation6]   ;;  %s512_s20 = smov [#allocation9]  }
   0x4   :  { %s31_s19 = sshll.u32 %s511_s18, 4  ;;  %s54_s21 = sshll.u32 %s512_s20, 4  ;;  %s32_s19 = int_to_ptr.vmem [resolvable:$true] %s31_s19  ;;  %s550_s21 = int_to_ptr.vmem [resolvable:$true] %s54_s21 }
   0x5   :  { %s371_s24 = scalar_lea.hbm %s650_s1, 2048 }
   0x6   :  { %p372_p0 = scmp.ne.s32.totalorder %s650_s1, %s371_s24  ;;  %p375_p1 = scmp.lt.u32.totalorder %s371_s24, %s650_s1 }
   0x8   :  { %p377_p2 = pnand %p375_p1, %p372_p0 }
   0xa   :  { %380 = shalt.err (!%p377_p2)
}
   0xb   :  { %s381_s29 = scalar_lea.vmem %s32_s19, 2048  ;;  %p386_p4 = scmp.lt.s32.totalorder %s32_s19, %s32_s19 }
   0xc   :  { %p382_p3 = scmp.ne.s32.totalorder %s32_s19, %s381_s29  ;;  %p387_p5 = scmp.lt.s32.totalorder %s381_s29, %s381_s29 }
   0xe   :  { %p388_p6 = por %p387_p5, %p386_p4 }
  0x10   :  { %p389_p7 = pnand %p388_p6, %p382_p3 }
  0x12   :  { %392 = shalt.err (!%p389_p7)
}
  0x13   :  { %s513_s30 = smov 128   ;;  %s514_s6 = smov 8  }
  0x14   :  { %37 = dma.hbm_to_vmem [thread:$0]  %s650_s1, 2048, %s32_s19, [#allocation7], %s513_s30, %s513_s30, %s514_s6  }
  0x15   :  { %s393_s11 = scalar_lea.hbm %s652_s3, 16 }
  0x16   :  { %p394_p8 = scmp.ne.s32.totalorder %s652_s3, %s393_s11  ;;  %p397_p9 = scmp.lt.u32.totalorder %s393_s11, %s652_s3 }
  0x18   :  { %p399_p10 = pnand %p397_p9, %p394_p8 }
  0x1a   :  { %402 = shalt.err (!%p399_p10)
}
  0x1b   :  { %s403_s16 = scalar_lea.vmem %s550_s21, 16  ;;  %s407_s1 = scalar_lea.vmem %s550_s21, 32 }
  0x1c   :  { %p404_p11 = scmp.ne.s32.totalorder %s550_s21, %s403_s16  ;;  %p408_p12 = scmp.lt.s32.totalorder %s550_s21, %s550_s21 }
  0x1d   :  { %p409_p13 = scmp.lt.s32.totalorder %s407_s1, %s403_s16 }
  0x1f   :  { %p410_p0 = por %p409_p13, %p408_p12 }
  0x21   :  { %p411_p1 = pnand %p410_p0, %p404_p11 }
  0x23   :  { %414 = shalt.err (!%p411_p1)
}
  0x24   :  { %57 = dma.hbm_to_vmem [thread:$0]  %s652_s3, 16, %s550_s21, [#allocation10]  }
  0x25   :  { %s515_s19 = smov [#allocation3]   ;;  %s516_s22 = smov [#allocation8]  }
  0x26   :  { %s19_s20 = sshll.u32 %s515_s19, 4  ;;  %s44_s23 = sshll.u32 %s516_s22, 4  ;;  %s20_s20 = int_to_ptr.vmem [resolvable:$true] %s19_s20  ;;  %s45_s23 = int_to_ptr.vmem [resolvable:$true] %s44_s23 }
  0x27   :  { %s415_s26 = scalar_lea.hbm %s649_s0, 256 }
  0x28   :  { %p416_p2 = scmp.ne.s32.totalorder %s649_s0, %s415_s26  ;;  %p419_p3 = scmp.lt.u32.totalorder %s415_s26, %s649_s0 }
  0x2a   :  { %p421_p4 = pnand %p419_p3, %p416_p2 }
  0x2c   :  { %424 = shalt.err (!%p421_p4)
}
  0x2d   :  { %s425_s3 = scalar_lea.vmem %s20_s20, 256  ;;  %p430_p6 = scmp.lt.s32.totalorder %s20_s20, %s20_s20 }
  0x2e   :  { %p426_p5 = scmp.ne.s32.totalorder %s20_s20, %s425_s3  ;;  %p431_p7 = scmp.lt.s32.totalorder %s425_s3, %s425_s3 }
  0x30   :  { %p432_p8 = por %p431_p7, %p430_p6 }
  0x32   :  { %p433_p9 = pnand %p432_p8, %p426_p5 }
  0x34   :  { %436 = shalt.err (!%p433_p9)
}
  0x35   :  { %25 = dma.hbm_to_vmem [thread:$0]  %s649_s0, 256, %s20_s20, [#allocation4], %s513_s30, %s513_s30, %s514_s6  }
  0x36   :  { %s437_s11 = scalar_lea.hbm %s651_s2, 16 }
  0x37   :  { %p438_p10 = scmp.ne.s32.totalorder %s651_s2, %s437_s11  ;;  %p441_p11 = scmp.lt.u32.totalorder %s437_s11, %s651_s2 }
  0x39   :  { %p443_p12 = pnand %p441_p11, %p438_p10 }
  0x3b   :  { %446 = shalt.err (!%p443_p12)
}
  0x3c   :  { %s447_s16 = scalar_lea.vmem %s45_s23, 16  ;;  %s451_s1 = scalar_lea.vmem %s45_s23, 32 }
  0x3d   :  { %p448_p13 = scmp.ne.s32.totalorder %s45_s23, %s447_s16  ;;  %p452_p0 = scmp.lt.s32.totalorder %s45_s23, %s45_s23 }
  0x3e   :  { %p453_p1 = scmp.lt.s32.totalorder %s451_s1, %s447_s16 }
  0x40   :  { %p454_p2 = por %p453_p1, %p452_p0 }
  0x42   :  { %p455_p3 = pnand %p454_p2, %p448_p13 }
  0x44   :  { %458 = shalt.err (!%p455_p3)
}
  0x45   :  { %47 = dma.hbm_to_vmem [thread:$0]  %s651_s2, 16, %s45_s23, [#allocation7]  }
  0x46   :  { %s517_s18 = smov [#allocation11]   ;;  %s459_s24 = scalar_lea.hbm %s653_s4, 16 }
  0x47   :  { %s64_s19 = sshll.u32 %s517_s18, 4  ;;  %p460_p4 = scmp.ne.s32.totalorder %s653_s4, %s459_s24  ;;  %s65_s19 = int_to_ptr.vmem [resolvable:$true] %s64_s19 }
  0x48   :  { %p463_p5 = scmp.lt.u32.totalorder %s459_s24, %s653_s4 }
  0x4a   :  { %p465_p6 = pnand %p463_p5, %p460_p4 }
  0x4c   :  { %468 = shalt.err (!%p465_p6)
}
  0x4d   :  { %s469_s29 = scalar_lea.vmem %s65_s19, 16  ;;  %s473_s2 = scalar_lea.vmem %s65_s19, 32 }
  0x4e   :  { %p470_p7 = scmp.ne.s32.totalorder %s65_s19, %s469_s29  ;;  %p474_p8 = scmp.lt.s32.totalorder %s65_s19, %s65_s19 }
  0x4f   :  { %p475_p9 = scmp.lt.s32.totalorder %s473_s2, %s469_s29 }
  0x51   :  { %p476_p10 = por %p475_p9, %p474_p8 }
  0x53   :  { %p477_p11 = pnand %p476_p10, %p470_p7 }
  0x55   :  { %480 = shalt.err (!%p477_p11)
}
  0x56   :  { %67 = dma.hbm_to_vmem [thread:$0]  %s653_s4, 16, %s65_s19, [#allocation10]  }
  0x57   :  { %503 = dma.done.wait [#allocation4], 256  }
  0x58   :  { %504 = vsyncadd [#allocation4], 4294967040 }
  0x59   :  { %505 = dma.done.wait [#allocation7], 2064  }
  0x5a   :  { %506 = vsyncadd [#allocation7], 4294965232 }
  0x5b   :  { %507 = dma.done.wait [#allocation10], 32  }
  0x5c   :  { %508 = vsyncadd [#allocation10], 4294967264  ;;  %vm87_vm0 = vcmask 261120   ;;  %v518_v0 = vmov 0.0   ;;  %v94_v1 = vld [vmem:[#allocation6] sm:$0xff]  ;;  %v95_v2 = vld [vmem:[#allocation6 + $0x8] sm:$0xff] }
  0x5d   :  { %89 = vst.msk [vmem:[#allocation2 + $0x8] sm:$0xff] %vm87_vm0, %v518_v0  ;;  %88 = vst.msk [vmem:[#allocation2] sm:$0xff] %vm87_vm0, %v518_v0  ;;  %v96_v3 = vld [vmem:[#allocation6 + $0x10] sm:$0xff]  ;;  %v326_v4 = vpack.c.bf16 %v95_v2, %v94_v1  ;;  %v97_v5 = vld [vmem:[#allocation6 + $0x18] sm:$0xff]  ;;  %s519_s4 = smov [#allocation12]  }
  0x5e   :  { %v330_v6 = vpack.c.bf16 %v97_v5, %v96_v3  ;;  %v98_v7 = vld [vmem:[#allocation6 + $0x20] sm:$0xff]  ;;  %v99_v8 = vld [vmem:[#allocation6 + $0x28] sm:$0xff]  ;;  %v92_v10 = vld [vmem:[#allocation3] sm:$0xff]  ;;  %s256_s3 = sshll.u32 %s519_s4, 4  ;;  %s257_s3 = int_to_ptr.vmem [resolvable:$true] %s256_s3 }
  0x5f   :  { %327 = vmatprep.subr.bf16.mxu0 %v326_v4  ;;  %v334_v9 = vpack.c.bf16 %v99_v8, %v98_v7  ;;  %v100_v11 = vld [vmem:[#allocation6 + $0x30] sm:$0xff]  ;;  %v101_v12 = vld [vmem:[#allocation6 + $0x38] sm:$0xff]  ;;  %323 = vmatprep.mubr.f32.mxu0 %v92_v10  ;;  %v102_v14 = vld [vmem:[#allocation6 + $0x40] sm:$0xff]  ;;  %s481_s21 = scalar_lea.vmem %s257_s3, 256  ;;  %p486_p13 = scmp.lt.s32.totalorder %s257_s3, %s257_s3 }
  0x60   :  { %329 = vmatpush3.bf16.msra.mxu0 %v326_v4  ;;  %v338_v13 = vpack.c.bf16 %v101_v12, %v100_v11  ;;  %v103_v15 = vld [vmem:[#allocation6 + $0x48] sm:$0xff]  ;;  %v104_v17 = vld [vmem:[#allocation6 + $0x50] sm:$0xff]  ;;  %v105_v18 = vld [vmem:[#allocation6 + $0x58] sm:$0xff]  ;;  %p482_p12 = scmp.ne.s32.totalorder %s257_s3, %s481_s21  ;;  %p487_p0 = scmp.lt.s32.totalorder %s481_s21, %s481_s21 }
  0x61   :  { %331 = vmatprep.subr.bf16.mxu0 %v330_v6  ;;  %v342_v16 = vpack.c.bf16 %v103_v15, %v102_v14  ;;  %v346_v19 = vpack.c.bf16 %v105_v18, %v104_v17  ;;  %v106_v20 = vld [vmem:[#allocation6 + $0x60] sm:$0xff]  ;;  %v107_v21 = vld [vmem:[#allocation6 + $0x68] sm:$0xff]  ;;  %v108_v23 = vld [vmem:[#allocation6 + $0x70] sm:$0xff] }
  0x62   :  { %v350_v22 = vpack.c.bf16 %v107_v21, %v106_v20  ;;  %v109_v24 = vld [vmem:[#allocation6 + $0x78] sm:$0xff]  ;;  %v270_v33 = vld [vmem:[#allocation8] ss:$0 sm:$0xff]  ;;  %v271_v57 = vld [vmem:[#allocation9] ss:$0 sm:$0xff]  ;;  %p488_p1 = por %p487_p0, %p486_p13 }
  0x63   :  { %v354_v25 = vpack.c.bf16 %v109_v24, %v108_v23  ;;  %v93_v26 = vld [vmem:[#allocation3 + $0x8] sm:$0xff]  ;;  %v272_v59 = vld [vmem:[#allocation11] ss:$0 sm:$0xff] }
  0x64   :  { %333 = vmatpush3.bf16.msra.mxu0 %v330_v6  ;;  %v91_v27 = vld [vmem:[#allocation2 + $0x8] sm:$0xff]  ;;  %v90_v28 = vld [vmem:[#allocation2] sm:$0xff]  ;;  %p489_p2 = pnand %p488_p1, %p482_p12 }
  0x65   :  { %335 = vmatprep.subr.bf16.mxu0 %v334_v9 }
  0x68   :  { %337 = vmatpush3.bf16.msra.mxu0 %v334_v9 }
  0x69   :  { %339 = vmatprep.subr.bf16.mxu0 %v338_v13 }
  0x6c   :  { %341 = vmatpush3.bf16.msra.mxu0 %v338_v13 }
  0x6d   :  { %343 = vmatprep.subr.bf16.mxu0 %v342_v16 }
  0x70   :  { %345 = vmatpush3.bf16.msra.mxu0 %v342_v16 }
  0x71   :  { %347 = vmatprep.subr.bf16.mxu0 %v346_v19 }
  0x74   :  { %349 = vmatpush3.bf16.msra.mxu0 %v346_v19 }
  0x75   :  { %351 = vmatprep.subr.bf16.mxu0 %v350_v22 }
  0x78   :  { %353 = vmatpush3.bf16.msra.mxu0 %v350_v22 }
  0x79   :  { %355 = vmatprep.subr.bf16.mxu0 %v354_v25 }
  0x7c   :  { %357 = vmatpush3.bf16.msra.mxu0 %v354_v25 }
  0x7f   :  { %324 = vmatmul.mubr.f32.vlgmr.msra.gmra.mrb[0].mxu0 %v93_v26 }
 0x152   :  { %v325_v29 = vpop.f32.mrb[0].mxu0 }
 0x153   :  { %v186_v30 = vadd.f32 %v325_v29, %v91_v27  ;;  %v176_v31 = vpop.f32.mrb[1].mxu0 }
 0x154   :  { %v185_v32 = vadd.f32 %v176_v31, %v90_v28 }
 0x155   :  { %189 = vst.msk [vmem:[#allocation2 + $0x8] sm:$0xff] %vm87_vm0, %v186_v30 }
 0x156   :  { %188 = vst.msk [vmem:[#allocation2] sm:$0xff] %vm87_vm0, %v185_v32 }
 0x15c   :  { %v194_v35 = vld [vmem:[#allocation2 + $0x8] sm:$0xff] }
 0x15d   :  { %v193_v34 = vld [vmem:[#allocation2] sm:$0xff]  ;;  %v203_v38 = vadd.f32 %v270_v33, %v194_v35 }
 0x15e   :  { %v202_v36 = vadd.f32 %v270_v33, %v193_v34 }
 0x15f   :  { %v207_v39 = vsel %vm87_vm0, %v203_v38, 0.0 }
 0x160   :  { %v204_v37 = vsel %vm87_vm0, %v202_v36, 0.0 }
 0x161   :  { %205 = vadd.xlane.f32.xlu0 %v204_v37 }
 0x165   :  { %208 = vadd.xlane.f32.xlu0 %v207_v39 }
 0x1ee   :  { %v206_v40 = vpop.xlane.xlu0 %205 }
 0x1ef   :  { %v211_v41 = vmul.f32 0.03125, %v206_v40 }
 0x1f1   :  { %v213_v42 = vsub.f32 %v202_v36, %v211_v41 }
 0x1f2   :  { %v209_v43 = vpop.xlane.xlu0 %208 }
 0x1f3   :  { %v212_v44 = vmul.f32 0.03125, %v209_v43  ;;  %v215_v45 = vmul.f32 %v213_v42, %v213_v42 }
 0x1f5   :  { %v214_v46 = vsub.f32 %v203_v38, %v212_v44  ;;  %v217_v47 = vsel %vm87_vm0, %v215_v45, 0.0 }
 0x1f6   :  { %218 = vadd.xlane.f32.xlu1 %v217_v47 }
 0x1f7   :  { %v216_v48 = vmul.f32 %v214_v46, %v214_v46 }
 0x1f9   :  { %v220_v49 = vsel %vm87_vm0, %v216_v48, 0.0 }
 0x1fa   :  { %221 = vadd.xlane.f32.xlu1 %v220_v49 }
 0x283   :  { %v219_v50 = vpop.xlane.xlu1 %218 }
 0x284   :  { %v223_v51 = vmul.f32 0.03125, %v219_v50 }
 0x286   :  { %v225_v52 = vadd.f32 1e-12, %v223_v51 }
 0x287   :  { %v222_v53 = vpop.xlane.xlu1 %221 }
 0x288   :  { %367 = vrsqrt.f32 %v225_v52  ;;  %v224_v54 = vmul.f32 0.03125, %v222_v53 }
 0x28a   :  { %v226_v55 = vadd.f32 1e-12, %v224_v54 }
 0x28c   :  { %369 = vrsqrt.f32 %v226_v55 }
 0x292   :  { %v368_v56 = vpop.eup %367 }
 0x293   :  { %v229_v58 = vmul.f32 %v368_v56, %v213_v42 }
 0x295   :  { %v238_v60 = vmul.f32 %v271_v57, %v229_v58 }
 0x296   :  { %v370_v61 = vpop.eup %369 }
 0x297   :  { %v230_v62 = vmul.f32 %v370_v61, %v214_v46  ;;  %v247_v63 = vadd.f32 %v272_v59, %v238_v60 }
 0x299   :  { %v239_v0 = vmul.f32 %v271_v57, %v230_v62  ;;  %249 = vst.msk [vmem:[#allocation12] sm:$0xff] %vm87_vm0, %v247_v63 }
 0x29b   :  { %v248_v1 = vadd.f32 %v272_v59, %v239_v0 }
 0x29d   :  { %250 = vst.msk [vmem:[#allocation12 + $0x8] sm:$0xff] %vm87_vm0, %v248_v1 }
 0x29e   :  { %492 = shalt.err (!%p489_p2)
}
 0x29f   :  { %s493_s10 = scalar_lea.hbm %s654_s5, 256 }
 0x2a0   :  { %p494_p3 = scmp.ne.s32.totalorder %s654_s5, %s493_s10  ;;  %p497_p4 = scmp.lt.u32.totalorder %s493_s10, %s654_s5 }
 0x2a2   :  { %p499_p5 = pnand %p497_p4, %p494_p3 }
 0x2a4   :  { %502 = shalt.err (!%p499_p5)
}
 0x2a5   :  { %262 = dma.vmem_to_hbm [thread:$0]  %s257_s3, 256, %s654_s5, [#allocation5], %s513_s30, %s513_s30, %s514_s6  }
 0x2a6   :  { %509 = dma.done.wait [#allocation5], 256  }
 0x2a7   :  { %510 = vsyncadd [#allocation5], 4294967040 }
 0x2a8   :  { %266 = vsyncpa [#allocation4], 1 }
 0x2a9   :  { %267 = vsyncpa [#allocation7], 1 }
 0x2aa   :  { %268 = vsyncpa [#allocation10], 1 }
 0x2ab   :  { %269 = vsyncpa [#allocation5], 1 }

</bundles_post_ra>
